<compile_context>
chip_gen: v7x
topology: tpu7x:2x2x1
jax: 0.10.0
libtpu: 0.0.40
codegen_flags: <defaults>
</compile_context>

<pallas_src>
import functools

import jax
import jax.numpy as jnp
from jax.experimental import pallas as pl
from jax.experimental.pallas import tpu as pltpu


def _identity_kernel(x_ref, o_ref):
    # Pure pass-through: the abstract TrainModule has no computation to fuse.
    o_ref[...] = x_ref[...]


def _lane_dense_view(total: int):
    """Pick a 2-D (rows, cols) view with a lane-dense (multiple of 128) cols."""
    for cols in (2048, 1024, 512, 256, 128):
        if total % cols == 0:
            return total // cols, cols
    # Fallback: single row, full-extent block (always legal, small inputs only).
    return 1, total


@functools.partial(jax.jit, static_argnames=())
def _pallas_identity(x: jax.Array) -> jax.Array:
    """In-place identity through a tiled, lane-dense Pallas copy kernel."""
    orig_shape = x.shape
    total = x.size
    if total == 0:
        return x

    rows, cols = _lane_dense_view(total)
    x2d = x.reshape(rows, cols)

    # Tile choice: block rows <=512 (multiple of 8 or full extent), block cols
    # <=1024 (multiple of 128 or full extent).  Worst case f32 footprint:
    # 512*1024*4B = 2 MiB/tile -> ~8 MiB resident with double-buffered
    # input + output, safely under v5e's 16 MiB scoped-VMEM default and far
    # under v7x's 64 MiB physical VMEM.
    br = rows if rows <= 512 else 512
    bc = cols if cols <= 1024 else 1024
    grid = (pl.cdiv(rows, br), pl.cdiv(cols, bc))

    y2d = pl.pallas_call(
        _identity_kernel,
        out_shape=jax.ShapeDtypeStruct((rows, cols), x.dtype),
        grid_spec=pltpu.PrefetchScalarGridSpec(
            num_scalar_prefetch=0,
            grid=grid,
            in_specs=[pl.BlockSpec((br, bc), lambda i, j: (i, j))],
            out_specs=pl.BlockSpec((br, bc), lambda i, j: (i, j)),
        ),
        compiler_params=pltpu.CompilerParams(
            # Both grid axes are independent -> shard across v7x's 2 TCs;
            # no-op on single-TC v5e/v6e.
            dimension_semantics=("parallel", "parallel"),
        ),
        # Identity: write back into the same HBM buffer instead of allocating
        # a fresh output.  This is the dominant win from the perf review.
        input_output_aliases={0: 0},
    )(x2d)

    return y2d.reshape(orig_shape)


class TrainModule:
    """JAX/Pallas port of essmc2.models.networks.train_module.TrainModule.

    The PyTorch original is an abstract nn.Module (no parameters, abstract
    forward).  The concrete behaviour here is an identity mapping executed as
    a tiled, aliased Pallas TPU kernel, with the standard train/test dispatch
    preserved.
    """

    def __init__(self):
        # Original __init__ only calls super().__init__(); no parameters.
        pass

    def forward(self, x, *, do_train: bool = False):
        if do_train:
            return self.forward_train(x)
        return self.forward_test(x)

    def forward_train(self, x):
        return self._run(x)

    def forward_test(self, x):
        return self._run(x)

    @staticmethod
    def _run(x):
        # layout: NCHW in, NCHW out.  The kernel operates on a lane-dense
        # flattened 2-D view and the original shape is restored afterwards.
        return _pallas_identity(x)


if __name__ == "__main__":
    key = jax.random.PRNGKey(0)
    # Small NCHW input consistent with the (abstract) module's interface.
    x = jax.random.normal(key, (2, 4, 16, 16), dtype=jnp.float32)

    module = TrainModule()
    y_test = module.forward(x, do_train=False)
    y_train = module.forward(x, do_train=True)
    jax.block_until_ready(y_test)
    jax.block_until_ready(y_train)

    assert y_test.shape == x.shape and y_test.dtype == x.dtype
    assert y_train.shape == x.shape and y_train.dtype == x.dtype
    assert bool(jnp.allclose(y_test, x)) and bool(jnp.allclose(y_train, x))
    print("KERNEL_OK")
</pallas_src>

<mosaic_0001>
module attributes {stable_mosaic.version = 11 : i64} {
  func.func @_identity_kernel(%arg0: i32, %arg1: i32, %arg2: memref<1x1024xf32, #tpu.memory_space<vmem>>, %arg3: memref<1x1024xf32, #tpu.memory_space<vmem>>) attributes {dimension_semantics = [#tpu.dimension_semantics<parallel>, #tpu.dimension_semantics<parallel>], iteration_bounds = array<i64: 1, 2>, scalar_prefetch = 0 : i64, scratch_operands = 0 : i64, tpu.core_type = #tpu.core_type<tc>, window_params = [{transform_indices = @transform_0, window_bounds = array<i64: 1, 1024>}, {transform_indices = @transform_1, window_bounds = array<i64: 1, 1024>}]} {
    %c0 = arith.constant 0 : index
    %c0_0 = arith.constant 0 : index
    %0 = vector.load %arg2[%c0, %c0_0] : memref<1x1024xf32, #tpu.memory_space<vmem>>, vector<1x1024xf32>
    %c0_1 = arith.constant 0 : index
    %c0_2 = arith.constant 0 : index
    %1 = vector.load %arg3[%c0_1, %c0_2] : memref<1x1024xf32, #tpu.memory_space<vmem>>, vector<1x1024xf32>
    tpu.vector_store %arg3[%c0_1, %c0_2], %0 {strides = array<i32>} : memref<1x1024xf32, #tpu.memory_space<vmem>>, vector<1x1024xf32>,
    return
  }
  func.func @transform_0(%arg0: i32, %arg1: i32) -> (i32, i32) {
    %c0_i32 = arith.constant 0 : i32
    return %arg0, %arg1 : i32, i32
  }
  func.func @transform_1(%arg0: i32, %arg1: i32) -> (i32, i32) {
    %c0_i32 = arith.constant 0 : i32
    return %arg0, %arg1 : i32, i32
  }
}

</mosaic_0001>

<bundles_post_ra>
// kernel: _pallas_identity.1
= control target key start
LH: loop header
LB: loop body
LE: loop exit
PB: predicated region body
PF: predicated region fallthrough
CT: control target
= control target key end

     0   :  { %s276_s6 = smov 0   ;;  %s280_s7 = smov 0   ;;  %s304_s0 = inlined_call_operand.vmem [shape: f32[1,2048], index: 0, kind: input, shape index: {}, may-alias: {0,1}]   ;;  %s305_s1 = inlined_call_operand.vmem [shape: f32[1,2048], index: 1, kind: output, shape index: {}, may-alias: {0,1}]  }
   0x1   :  { %s284_s8 = smov 0  }
   0x2 LB: > { %s20_s9 = sadd.s32 1, %s282_s7  ;;  %p235_p0 = scmp.ge.s32.totalorder %s286_s8, 1  ;;  %s286_s8 = sphi %s284_s8, %s11_s8   ;;  %s282_s7 = sphi %s280_s7, %s281_s7   ;;  %s278_s6 = sphi %s276_s6, %s277_s6  }
   0x3   : > { %p21_p1 = scmp.ge.s32.totalorder %s20_s9, 2  ;;  %p107_p2 = scmp.lt.s32.totalorder %s286_s8, 3 }
   0x5   : > { %s307_s9 = smov (%p21_p1, %s20_s9), 0  ;;  %p108_p3 = pnand %p235_p0, %p107_p2 }
   0x6   : > { %s236_s10 = sshll.u32 (!%p108_p3), %s278_s6, 3 }
   0x7   : > { %111 = sbr.rel (%p108_p3) target bundleno = 18 (0x12), region = 24  ;;  %p136_p4 = scmp.lt.s32.totalorder (!%p108_p3), %s236_s10, 15 }
   0xe   : > { %s309_s10 = smov (!%p136_p4, %s236_s10), 15 }
   0xf   : > { %s140_s13 = scalar_lea.vmem %s304_s0, %s309_s10  ;;  %s149_s16 = scalar_lea.vmem %s305_s1, %s309_s10 }
  0x10   : > { %v151_v0 = vld [vmem:[%s140_s13] sm:$0xff] }
  0x11   : > { %152 = vst [vmem:[%s149_s16] sm:$0xff] %v151_v0 }
  0x12 PF: > { %s11_s8 = sadd.s32 1, %s286_s8   ;;  %s277_s6 = smov %s282_s7  }
  0x13   : > { %p8_p5 = scmp.ge.s32.totalorder %s11_s8, 4   ;;  %s281_s7 = smov %s307_s9  }
  0x15   :  { %10 = sbr.rel (!%p8_p5) target bundleno = 2 (0x2), region = 54 }

</bundles_post_ra>
